<compile_context>
chip_gen: v7x
topology: tpu7x:2x2x1
jax: 0.10.0
libtpu: 0.0.40
codegen_flags: <defaults>
</compile_context>

<pallas_src>
import functools

import jax
import jax.numpy as jnp
from jax.experimental import pallas as pl
from jax.experimental.pallas import tpu as pltpu


# -----------------------------------------------------------------------------
# Kernels
# -----------------------------------------------------------------------------
def _outcome_head_kernel(x_ref, w_ref, b_ref, o_ref):
    # Row-major form.  x_ref: [TB, H], w_ref: [H, O] (pre-scaled by 0.5),
    # b_ref: [1, O] (pre-scaled by 0.5), o_ref: [TB, O].
    # sigmoid(z) = 0.5*tanh(z/2) + 0.5; the /2 is folded into w/b at prep time,
    # so this is one MXU dot, one VPU add, one EUP tanh, one VPU FMA.
    acc = jnp.dot(x_ref[...], w_ref[...], preferred_element_type=jnp.float32)
    acc = acc + b_ref[...].astype(jnp.float32)
    o_ref[...] = (0.5 * jnp.tanh(acc) + 0.5).astype(o_ref.dtype)


def _outcome_head_kernel_t(w_ref, x_ref, b_ref, o_ref):
    # Lane-dense (transposed) form: the batch tile is the LAST (lane) dim.
    # w_ref: [O, H] (pre-scaled), x_ref: [H, TB], b_ref: [O, 1] (pre-scaled),
    # o_ref: [O, TB] -> unmasked, lane-dense stores.
    acc = jnp.dot(w_ref[...], x_ref[...], preferred_element_type=jnp.float32)
    acc = acc + b_ref[...].astype(jnp.float32)
    o_ref[...] = (0.5 * jnp.tanh(acc) + 0.5).astype(o_ref.dtype)


# -----------------------------------------------------------------------------
# One-time parameter prep (keep OFF the per-call path)
# -----------------------------------------------------------------------------
def prepare_outcome_head_params(weight, bias, dtype=jnp.float32):
    """weight: [O, H] (PyTorch nn.Linear layout), bias: [O].

    Folds the 0.5 pre-scale of the tanh-form sigmoid into the parameters and
    materializes both layouts (row-major [H, O] and lane-dense [O, H]).  The
    weights are tiny (O*H elements), so the duplication is free.
    `dtype` may be jnp.bfloat16 on v6e/v7x to halve x/w bytes; accumulation
    and the epilogue stay f32 inside the kernel.
    """
    w = jnp.asarray(weight, dtype=jnp.float32)            # [O, H]
    b = jnp.asarray(bias, dtype=jnp.float32)               # [O]
    half_w = 0.5 * w
    half_b = 0.5 * b
    return {
        "w_t_half": half_w.T.astype(dtype),                 # [H, O]
        "b_row_half": half_b.reshape(1, -1),                 # [1, O] (f32)
        "w_half": half_w.astype(dtype),                      # [O, H]
        "b_col_half": half_b.reshape(-1, 1),                 # [O, 1] (f32)
    }


# -----------------------------------------------------------------------------
# Helpers
# -----------------------------------------------------------------------------
def _cost(B, H, O, x_itemsize, w_itemsize, out_itemsize):
    return pl.CostEstimate(
        flops=2 * B * H * O + 2 * B * O,           # matmul + bias/epilogue
        transcendentals=B * O,                      # tanh (sigmoid)
        bytes_accessed=(x_itemsize * B * H
                        + w_itemsize * H * O
                        + 4 * O
                        + out_itemsize * B * O),
    )


def _round_up(n, m):
    return ((n + m - 1) // m) * m


def _pick_batch_tile(B, *, lane_dense=False, target_tb=4096):
    """Pick a batch-tile size.

    * big tiles (default 4096 rows) to amortize the ~0.35 us per-grid-step
      overhead and keep HBM DMAs long,
    * rows aligned to 8 sublanes -- or 128 lanes for the lane-dense layout,
    * >= 2 grid steps (and an even count when cheap) so v7x's two TensorCores
      both get work via the "parallel" batch axis.
    """
    align = 128 if lane_dense else 8
    if B <= 2 * align:
        return B                                     # single full-size block
    tb = min(target_tb, _round_up(pl.cdiv(B, 2), align))
    tb = max(tb, align)
    steps = pl.cdiv(B, tb)
    if steps > 1 and steps % 2 == 1:                 # prefer an even grid (v7x)
        tb = max(align, _round_up(pl.cdiv(B, steps + 1), align))
    return tb


# Conservative budget for the grid-less path: smallest scoped-VMEM default is
# 16 MiB (v5e); Pallas double-buffers each operand, so stay well under that.
_GRIDLESS_VMEM_BUDGET = 6 * 1024 * 1024


# -----------------------------------------------------------------------------
# pallas_call wrappers
# -----------------------------------------------------------------------------
@jax.jit
def _outcome_head_gridless(x, w_t_half, b_row_half):
    B, H = x.shape
    O = w_t_half.shape[1]
    return pl.pallas_call(
        _outcome_head_kernel,
        out_shape=jax.ShapeDtypeStruct((B, O), x.dtype),
        cost_estimate=_cost(B, H, O, x.dtype.itemsize, w_t_half.dtype.itemsize,
                            x.dtype.itemsize),
    )(x, w_t_half, b_row_half)


@functools.partial(jax.jit, static_argnames=("tb",))
def _outcome_head_batched(x, w_t_half, b_row_half, *, tb):
    B, H = x.shape
    O = w_t_half.shape[1]
    return pl.pallas_call(
        _outcome_head_kernel,
        out_shape=jax.ShapeDtypeStruct((B, O), x.dtype),
        grid=(pl.cdiv(B, tb),),
        in_specs=[
            pl.BlockSpec((tb, H), lambda i: (i, 0)),      # x tile (double-buffered)
            pl.BlockSpec((H, O), lambda i: (0, 0)),       # weight, VMEM-resident
            pl.BlockSpec((1, O), lambda i: (0, 0)),       # bias, VMEM-resident
        ],
        out_specs=pl.BlockSpec((tb, O), lambda i: (i, 0)),
        compiler_params=pltpu.CompilerParams(
            dimension_semantics=("parallel",),
        ),
        cost_estimate=_cost(B, H, O, x.dtype.itemsize, w_t_half.dtype.itemsize,
                            x.dtype.itemsize),
    )(x, w_t_half, b_row_half)


@functools.partial(jax.jit, static_argnames=("tb",))
def _outcome_head_lane_dense_call(x_t, w_half, b_col_half, *, tb):
    H, B = x_t.shape
    O = w_half.shape[0]
    return pl.pallas_call(
        _outcome_head_kernel_t,
        out_shape=jax.ShapeDtypeStruct((O, B), x_t.dtype),
        grid=(pl.cdiv(B, tb),),
        in_specs=[
            pl.BlockSpec((O, H), lambda i: (0, 0)),       # weight, VMEM-resident
            pl.BlockSpec((H, tb), lambda i: (0, i)),      # x tile (lane axis = batch)
            pl.BlockSpec((O, 1), lambda i: (0, 0)),       # bias, VMEM-resident
        ],
        out_specs=pl.BlockSpec((O, tb), lambda i: (0, i)),  # lane-dense output slab
        compiler_params=pltpu.CompilerParams(
            dimension_semantics=("parallel",),
        ),
        cost_estimate=_cost(B, H, O, x_t.dtype.itemsize, w_half.dtype.itemsize,
                            x_t.dtype.itemsize),
    )(w_half, x_t, b_col_half)


# -----------------------------------------------------------------------------
# Public entry points
# -----------------------------------------------------------------------------
def outcome_head_forward(x, params, *, target_tb=4096):
    """sigmoid(x @ W.T + b); Dropout(p=0.0) is the identity.  Returns [B, O].

    VMEM-aware dispatch: grid-less single shot when the whole problem fits
    comfortably in scoped VMEM, otherwise the batch-tiled pipelined path.
    """
    B, H = x.shape
    O = params["w_t_half"].shape[1]
    est_vmem = (2 * (B * H + B * O) * x.dtype.itemsize
                + H * O * params["w_t_half"].dtype.itemsize + 4 * O)
    if est_vmem <= _GRIDLESS_VMEM_BUDGET:
        return _outcome_head_gridless(x, params["w_t_half"], params["b_row_half"])
    tb = _pick_batch_tile(B, lane_dense=False, target_tb=target_tb)
    return _outcome_head_batched(x, params["w_t_half"], params["b_row_half"], tb=tb)


def outcome_head_forward_lane_dense(x_t, params, *, target_tb=4096):
    """Lane-dense variant: takes x transposed as [H, B], returns [O, B].

    Same math, but the batch lives on the lane axis, so the O=16 output is a
    dense slab (unmasked stores / long DMAs).  Use when the producer/consumer
    can accept the transposed layout (pure layout plumbing, no extra compute).
    """
    H, B = x_t.shape
    tb = _pick_batch_tile(B, lane_dense=True, target_tb=target_tb)
    return _outcome_head_lane_dense_call(
        x_t, params["w_half"], params["b_col_half"], tb=tb)


def _reference(x, weight, bias):
    return jax.nn.sigmoid(x @ weight.T + bias)


# -----------------------------------------------------------------------------
# Self-test
# -----------------------------------------------------------------------------
if __name__ == "__main__":
    # Shapes consistent with the module: hidden_dim=32, output_dim=16, batch=8.
    B, H, O = 8, 32, 16

    key = jax.random.PRNGKey(0)
    kx, kw, kb, kx2, kx3 = jax.random.split(key, 5)

    x = jax.random.normal(kx, (B, H), dtype=jnp.float32)
    # Deterministic init mimicking nn.Linear's uniform(-1/sqrt(H), 1/sqrt(H)).
    bound = 1.0 / jnp.sqrt(jnp.float32(H))
    weight = jax.random.uniform(kw, (O, H), minval=-bound, maxval=bound,
                                dtype=jnp.float32)
    bias = jax.random.uniform(kb, (O,), minval=-bound, maxval=bound,
                              dtype=jnp.float32)

    params = prepare_outcome_head_params(weight, bias)

    # 1) Small batch -> dispatcher takes the grid-less path.
    out = jax.block_until_ready(outcome_head_forward(x, params))
    ref = _reference(x, weight, bias)
    assert out.shape == (B, O)
    assert jnp.allclose(out, ref, atol=1e-5, rtol=1e-5), "mismatch (gridless)"

    # 2) Large batch -> dispatcher takes the batch-tiled pipelined path.
    Bb = 65536
    xb = jax.random.normal(kx2, (Bb, H), dtype=jnp.float32)
    outb = jax.block_until_ready(outcome_head_forward(xb, params))
    refb = _reference(xb, weight, bias)
    assert outb.shape == (Bb, O)
    assert jnp.allclose(outb, refb, atol=1e-5, rtol=1e-5), "mismatch (tiled)"

    # 3) Lane-dense (transposed) path: x as [H, B], output as [O, B].
    Bt = 1024
    xt_src = jax.random.normal(kx3, (Bt, H), dtype=jnp.float32)
    x_t = xt_src.T                                   # [H, Bt] — layout plumbing
    outt = jax.block_until_ready(outcome_head_forward_lane_dense(x_t, params))
    reft = _reference(xt_src, weight, bias).T        # [O, Bt]
    assert outt.shape == (O, Bt)
    assert jnp.allclose(outt, reft, atol=1e-5, rtol=1e-5), "mismatch (lane-dense)"

    print("KERNEL_OK")
</pallas_src>

<mosaic_0001>
module attributes {stable_mosaic.version = 11 : i64} {
  func.func @_outcome_head_kernel(%arg0: memref<8x32xf32, #tpu.memory_space<vmem>>, %arg1: memref<32x16xf32, #tpu.memory_space<vmem>>, %arg2: memref<1x16xf32, #tpu.memory_space<vmem>>, %arg3: memref<8x16xf32, #tpu.memory_space<vmem>>) attributes {dimension_semantics = [], scalar_prefetch = 0 : i64, scratch_operands = 0 : i64, tpu.core_type = #tpu.core_type<tc>} {
    %c0 = arith.constant 0 : index
    %c0_0 = arith.constant 0 : index
    %0 = vector.load %arg0[%c0, %c0_0] : memref<8x32xf32, #tpu.memory_space<vmem>>, vector<8x32xf32>
    %c0_1 = arith.constant 0 : index
    %c0_2 = arith.constant 0 : index
    %1 = vector.load %arg1[%c0_1, %c0_2] : memref<32x16xf32, #tpu.memory_space<vmem>>, vector<32x16xf32>
    %cst = arith.constant dense<0.000000e+00> : vector<8x16xf32>
    %2 = tpu.matmul %0, %1, %cst {dimension_numbers = #tpu.dot_dimension_numbers<[1], [0], [0], [1], [0, 0, 1, 1], [], []>} : vector<8x32xf32>, vector<32x16xf32>, vector<8x16xf32> -> vector<8x16xf32>
    %c0_3 = arith.constant 0 : index
    %c0_4 = arith.constant 0 : index
    %3 = vector.load %arg2[%c0_3, %c0_4] : memref<1x16xf32, #tpu.memory_space<vmem>>, vector<1x16xf32>
    %4 = vector.broadcast %3 : vector<1x16xf32> to vector<8x16xf32>
    %5 = arith.addf %2, %4 : vector<8x16xf32>
    %6 = math.tanh %5 : vector<8x16xf32>
    %cst_5 = arith.constant 5.000000e-01 : f32
    %7 = vector.broadcast %cst_5 : f32 to vector<8x16xf32>
    %8 = arith.mulf %7, %6 : vector<8x16xf32>
    %cst_6 = arith.constant 5.000000e-01 : f32
    %9 = vector.broadcast %cst_6 : f32 to vector<8x16xf32>
    %10 = arith.addf %8, %9 : vector<8x16xf32>
    %c0_7 = arith.constant 0 : index
    %c0_8 = arith.constant 0 : index
    %11 = vector.load %arg3[%c0_7, %c0_8] : memref<8x16xf32, #tpu.memory_space<vmem>>, vector<8x16xf32>
    tpu.vector_store %arg3[%c0_7, %c0_8], %10 {strides = array<i32>} : memref<8x16xf32, #tpu.memory_space<vmem>>, vector<8x16xf32>,
    return
  }
}

</mosaic_0001>

<bundles_post_ra>
// kernel: _outcome_head_gridless.1
= control target key start
LH: loop header
LB: loop body
LE: loop exit
PB: predicated region body
PF: predicated region fallthrough
CT: control target
= control target key end

     0   :  { %v174_v3 = vmov 0.0|0.0   ;;  %vm175_vm0 = vmmov 0   ;;  %v176_v6 = vmov 0.0   ;;  %s228_s0 = inlined_call_operand.vmem [shape: f32[8,32], index: 0, kind: input, shape index: {}]   ;;  %s229_s1 = inlined_call_operand.vmem [shape: f32[32,16], index: 1, kind: input, shape index: {}]   ;;  %s230_s2 = inlined_call_operand.vmem [shape: f32[1,16], index: 2, kind: input, shape index: {}]   ;;  %s231_s3 = inlined_call_operand.hbm [shape: f32[8,16], index: 3, kind: output, shape index: {}]  }
   0x1   :  { %v16_v0 = vld [vmem:[%s229_s1] sm:$0xff]  ;;  %v17_v1 = vld [vmem:[%s229_s1 + $0x8] sm:$0xff]  ;;  %v18_v2 = vld [vmem:[%s229_s1 + $0x10] sm:$0xff]  ;;  %138 = vmatprep.subr.bf16.mxu0 %v174_v3  ;;  %135 = vmatprep.mubr.msk.f32.mxu0 %vm175_vm0, %v176_v6 }
   0x2   :  { %v139_v4 = vpack.c.bf16 %v17_v1, %v16_v0  ;;  %v19_v5 = vld [vmem:[%s229_s1 + $0x18] sm:$0xff] }
   0x3   :  { %8 = vsyncpa [#allocation3], 0  ;;  %v142_v7 = vpack.c.bf16 %v19_v5, %v18_v2  ;;  %v15_v8 = vld [vmem:[%s228_s0] sm:$0xff]  ;;  %vm27_vm1 = vcmask 261120   ;;  %s177_s1 = smov [#allocation2]   ;;  %vm104_vm2 = vcmask 130048  }
   0x4   :  { %140 = vmatpush3.bf16.msra.mxu0 %v139_v4  ;;  %v120_v9 = vld [vmem:[%s230_s2] ss:$0 sm:$0xff]  ;;  %s112_s24 = sshll.u32 %s177_s1, 4  ;;  %s113_s24 = int_to_ptr.vmem [resolvable:$true] %s112_s24 }
   0x5   :  { %141 = vmatprep.subr.bf16.mxu0 %v174_v3  ;;  %s150_s25 = scalar_lea.vmem %s113_s24, 128  ;;  %p155_p1 = scmp.lt.s32.totalorder %s113_s24, %s113_s24 }
   0x6   :  { %p151_p0 = scmp.ne.s32.totalorder %s113_s24, %s150_s25  ;;  %p156_p2 = scmp.lt.s32.totalorder %s150_s25, %s150_s25 }
   0x8   :  { %143 = vmatpush3.bf16.msra.mxu0 %v142_v7  ;;  %p157_p3 = por %p156_p2, %p155_p1 }
   0xa   :  { %p158_p4 = pnand %p157_p3, %p151_p0 }
   0xb   :  { %136 = vmatmul.mubr.msk.f32.vlgmr.msra.gmra.mrb[0].mxu0 %vm27_vm1, %v15_v8 }
  0xde   :  { %v97_v10 = vpop.f32.mrb[0].mxu0 }
  0xdf   :  { %v98_v11 = vadd.f32 %v120_v9, %v97_v10  ;;  %v137_v12 = vpop.f32.mrb[1].mxu0 }
  0xe1   :  { %148 = vtanh.f32 %v98_v11 }
  0xeb   :  { %v149_v13 = vpop.eup %148 }
  0xec   :  { %v102_v14 = vmul.f32 0.5, %v149_v13 }
  0xee   :  { %v103_v15 = vadd.f32 0.5, %v102_v14 }
  0xf0   :  { %105 = vst.msk [vmem:[#allocation2] sm:$0xff] %vm104_vm2, %v103_v15 }
  0xf1   :  { %161 = shalt.err (!%p158_p4)
}
  0xf2   :  { %s162_s26 = scalar_lea.hbm %s231_s3, 128 }
  0xf3   :  { %p163_p5 = scmp.ne.s32.totalorder %s231_s3, %s162_s26  ;;  %p166_p6 = scmp.lt.u32.totalorder %s162_s26, %s231_s3 }
  0xf5   :  { %p168_p7 = pnand %p166_p6, %p163_p5 }
  0xf7   :  { %171 = shalt.err (!%p168_p7)
}
  0xf8   :  { %115 = dma.vmem_to_hbm [thread:$0]  %s113_s24, 128, %s231_s3, [#allocation3]  }
  0xf9   :  { %172 = dma.done.wait [#allocation3], 128  }
  0xfa   :  { %173 = vsyncadd [#allocation3], 4294967168 }
  0xfb   :  { %119 = vsyncpa [#allocation3], 1 }

</bundles_post_ra>
